<compile_context>
chip_gen: v7x
topology: tpu7x:2x2x1
jax: 0.10.0
libtpu: 0.0.40
codegen_flags: <defaults>
</compile_context>

<pallas_src>
import jax
import jax.numpy as jnp
from jax import lax
from jax.experimental import pallas as pl
from jax.experimental.pallas import tpu as pltpu


def _feature_aggregation_kernel(content_ref, caption_ref, image_ref, ftr2_ref,
                                ftr3_ref, w_ref, o_ref):
    # One batch tile of every feature stream is resident in VMEM.
    c = content_ref[...].astype(jnp.float32)     # (TB, D)
    cap = caption_ref[...].astype(jnp.float32)   # (TB, D)
    img = image_ref[...].astype(jnp.float32)     # (TB, D)
    f2 = ftr2_ref[...].astype(jnp.float32)       # (TB, D)
    f3 = ftr3_ref[...].astype(jnp.float32)       # (TB, D)
    w = w_ref[...].astype(jnp.float32)           # (1, D) broadcasts over rows

    # --- ImageCaptionGate: cosine similarity along the feature axis ---------
    # torch clamps the norm product at eps; rsqrt keeps this on the EUP slot.
    eps = 1e-8
    dot_cc = jnp.sum(c * cap, axis=-1, keepdims=True)                  # (TB, 1)
    ssq_c = jnp.sum(c * c, axis=-1, keepdims=True)
    ssq_cap = jnp.sum(cap * cap, axis=-1, keepdims=True)
    gate = dot_cc * lax.rsqrt(jnp.maximum(ssq_c * ssq_cap, eps * eps)) # (TB, 1)

    # --- MaskAttention scores: s_k = f_k @ w^T (shared bias dropped:
    #     softmax over the 4 scores is invariant to it).
    #     The gated image feature is never materialized: its score factors as
    #     gate * (image @ w).
    s0 = jnp.sum(c * w, axis=-1, keepdims=True)                        # (TB, 1)
    s1 = gate * jnp.sum(img * w, axis=-1, keepdims=True)
    s2 = jnp.sum(f2 * w, axis=-1, keepdims=True)
    s3 = jnp.sum(f3 * w, axis=-1, keepdims=True)

    # Softmax over the 4 stacked features (kept entirely in vregs).
    m = jnp.maximum(jnp.maximum(s0, s1), jnp.maximum(s2, s3))
    e0 = jnp.exp(s0 - m)
    e1 = jnp.exp(s1 - m)
    e2 = jnp.exp(s2 - m)
    e3 = jnp.exp(s3 - m)
    inv = pl.reciprocal(e0 + e1 + e2 + e3, approx=True)                # (TB, 1)

    # Weighted sum of the 4 features -> lane-dense (TB, D) output.
    # (e1 * gate) is (TB,1): the gated image term without a (TB,D) temporary.
    out = (e0 * c + (e1 * gate) * img + e2 * f2 + e3 * f3) * inv
    o_ref[...] = out.astype(o_ref.dtype)


def _round_up(x, m):
    return (x + m - 1) // m * m


def _derive_batch_tile(batch, emb_dim_padded, itemsize):
    """Pick the batch tile: ~1 MiB of DMA per stream per step, VMEM-capped."""
    # DMA target: keep the per-step fixed overhead (~0.35 us) well amortized.
    target = max(8, (1 << 20) // (itemsize * emb_dim_padded))
    # VMEM cap (conservative for v7x 64 MiB/TC and v5e): 6 double-buffered I/O
    # streams plus ~4 tile-sized f32 compiler temporaries, budgeted at 40 MiB.
    per_row = (6 * 2 * itemsize + 4 * 4) * emb_dim_padded
    cap = max(8, (40 << 20) // per_row)
    tb = min(target, cap)
    if batch > 16:
        # Keep grid length >= 2 so v7x's two TensorCores both get work.
        tb = min(tb, _round_up(pl.cdiv(batch, 2), 8))
    tb = max(8, (tb // 8) * 8)
    tb = min(tb, _round_up(batch, 8))
    return tb


def feature_aggregation(content, caption, image, ftr2, ftr3, w, b=None,
                        *, block_batch=None, interpret=False):
    """Fused FeatureAggregation forward. All feature inputs are (batch, emb_dim).

    `b` (the Linear(D,1) bias) is accepted for interface parity but unused:
    a bias shared by all four scores is softmax-invariant, so the output is
    numerically identical to the PyTorch module.
    """
    del b  # softmax-invariant
    batch, emb_dim = content.shape
    for t in (caption, image, ftr2, ftr3):
        assert t.shape == (batch, emb_dim)

    # Lane-dense layout: pad the feature axis to a multiple of 128 so every
    # load/store is an unmasked full-lane access. Zero padding is exact for
    # every reduction in the kernel (dot products, norms, scores).
    d_pad = _round_up(emb_dim, 128)
    if d_pad != emb_dim:
        padw = ((0, 0), (0, d_pad - emb_dim))
        content, caption, image, ftr2, ftr3 = (
            jnp.pad(x, padw) for x in (content, caption, image, ftr2, ftr3))
        w2d = jnp.pad(jnp.asarray(w).reshape(-1),
                      (0, d_pad - emb_dim)).reshape(1, d_pad)
    else:
        w2d = jnp.asarray(w).reshape(1, d_pad)
    w2d = w2d.astype(jnp.float32)

    itemsize = jnp.dtype(content.dtype).itemsize
    tb = block_batch if block_batch is not None else _derive_batch_tile(
        batch, d_pad, itemsize)
    grid = (pl.cdiv(batch, tb),)

    feat_spec = pl.BlockSpec((tb, d_pad), lambda i: (i, 0))

    # Explicit scoped-VMEM budget (the default differs per generation).
    io_bytes = 6 * 2 * tb * d_pad * itemsize        # double-buffered streams
    tmp_bytes = 4 * tb * d_pad * 4                  # f32 temporaries headroom
    vmem_limit = int(min(56 << 20,
                         max(32 << 20, io_bytes + tmp_bytes + (2 << 20))))

    cost = pl.CostEstimate(
        flops=20 * batch * emb_dim,
        transcendentals=6 * batch,
        bytes_accessed=(6 * batch * emb_dim + emb_dim) * itemsize)

    out = pl.pallas_call(
        _feature_aggregation_kernel,
        out_shape=jax.ShapeDtypeStruct((batch, d_pad), content.dtype),
        grid=grid,
        in_specs=[
            feat_spec,                                     # content
            feat_spec,                                     # caption
            feat_spec,                                     # image
            feat_spec,                                     # FTR2
            feat_spec,                                     # FTR3
            pl.BlockSpec((1, d_pad), lambda i: (0, 0)),    # attention weight (resident)
        ],
        out_specs=feat_spec,
        compiler_params=pltpu.CompilerParams(
            dimension_semantics=("parallel",),
            vmem_limit_bytes=vmem_limit),
        cost_estimate=cost,
        interpret=interpret,
    )(content, caption, image, ftr2, ftr3, w2d)

    return out[:, :emb_dim] if d_pad != emb_dim else out


def _reference(content, caption, image, ftr2, ftr3, w, b):
    eps = 1e-8
    dot_cc = jnp.sum(content * caption, axis=1)
    nsq = jnp.sum(content * content, axis=1) * jnp.sum(caption * caption, axis=1)
    gate = (dot_cc / jnp.sqrt(jnp.maximum(nsq, eps * eps)))[:, None]
    feats = jnp.stack([content, gate * image, ftr2, ftr3], axis=1)      # (B,4,D)
    scores = jnp.sum(feats * w[None, None, :], axis=-1) + b[0]          # (B, 4)
    attn = jax.nn.softmax(scores, axis=-1)
    return jnp.sum(attn[..., None] * feats, axis=1)                     # (B, D)


def _make_inputs(key, batch, emb_dim):
    keys = jax.random.split(key, 7)
    feats = [jax.random.normal(keys[i], (batch, emb_dim), jnp.float32)
             for i in range(5)]
    # torch.nn.Linear(emb_dim, 1) default init: U(-1/sqrt(fan_in), 1/sqrt(fan_in)).
    bound = 1.0 / float(emb_dim) ** 0.5
    w = jax.random.uniform(keys[5], (emb_dim,), jnp.float32, -bound, bound)
    b = jax.random.uniform(keys[6], (1,), jnp.float32, -bound, bound)
    return feats, w, b


if __name__ == "__main__":
    key = jax.random.PRNGKey(0)

    # Case 1: aligned small shapes.
    batch, emb_dim = 8, 128
    (content, caption, image, ftr2, ftr3), w, b = _make_inputs(key, batch, emb_dim)
    out = feature_aggregation(content, caption, image, ftr2, ftr3, w, b)
    out = jax.block_until_ready(out)
    ref = _reference(content, caption, image, ftr2, ftr3, w, b)
    assert out.shape == (batch, emb_dim)
    assert jnp.allclose(out, ref, atol=2e-3, rtol=2e-3), float(
        jnp.max(jnp.abs(out - ref)))

    # Case 2: ragged batch + non-multiple-of-128 emb_dim (exercises pl.cdiv
    # masking of the last block and the lane padding path).
    batch2, emb2 = 13, 96
    (c2, cap2, i2, f22, f32_), w2, b2 = _make_inputs(jax.random.PRNGKey(1),
                                                     batch2, emb2)
    out2 = feature_aggregation(c2, cap2, i2, f22, f32_, w2, b2, block_batch=8)
    out2 = jax.block_until_ready(out2)
    ref2 = _reference(c2, cap2, i2, f22, f32_, w2, b2)
    assert out2.shape == (batch2, emb2)
    assert jnp.allclose(out2, ref2, atol=2e-3, rtol=2e-3), float(
        jnp.max(jnp.abs(out2 - ref2)))

    print("KERNEL_OK")
</pallas_src>

<mosaic_0001>
module attributes {stable_mosaic.version = 11 : i64} {
  func.func @_feature_aggregation_kernel(%arg0: i32, %arg1: memref<8x128xf32, #tpu.memory_space<vmem>>, %arg2: memref<8x128xf32, #tpu.memory_space<vmem>>, %arg3: memref<8x128xf32, #tpu.memory_space<vmem>>, %arg4: memref<8x128xf32, #tpu.memory_space<vmem>>, %arg5: memref<8x128xf32, #tpu.memory_space<vmem>>, %arg6: memref<1x128xf32, #tpu.memory_space<vmem>>, %arg7: memref<8x128xf32, #tpu.memory_space<vmem>>) attributes {dimension_semantics = [#tpu.dimension_semantics<parallel>], iteration_bounds = array<i64: 1>, scalar_prefetch = 0 : i64, scratch_operands = 0 : i64, tpu.core_type = #tpu.core_type<tc>, window_params = [{transform_indices = @transform_0, window_bounds = array<i64: 8, 128>}, {transform_indices = @transform_1, window_bounds = array<i64: 8, 128>}, {transform_indices = @transform_2, window_bounds = array<i64: 8, 128>}, {transform_indices = @transform_3, window_bounds = array<i64: 8, 128>}, {transform_indices = @transform_4, window_bounds = array<i64: 8, 128>}, {pipeline_mode = #tpu.pipeline_mode<synchronous>, transform_indices = @transform_5, window_bounds = array<i64: 1, 128>}, {transform_indices = @transform_6, window_bounds = array<i64: 8, 128>}]} {
    %c0 = arith.constant 0 : index
    %c0_0 = arith.constant 0 : index
    %0 = vector.load %arg1[%c0, %c0_0] : memref<8x128xf32, #tpu.memory_space<vmem>>, vector<8x128xf32>
    %c0_1 = arith.constant 0 : index
    %c0_2 = arith.constant 0 : index
    %1 = vector.load %arg2[%c0_1, %c0_2] : memref<8x128xf32, #tpu.memory_space<vmem>>, vector<8x128xf32>
    %c0_3 = arith.constant 0 : index
    %c0_4 = arith.constant 0 : index
    %2 = vector.load %arg3[%c0_3, %c0_4] : memref<8x128xf32, #tpu.memory_space<vmem>>, vector<8x128xf32>
    %c0_5 = arith.constant 0 : index
    %c0_6 = arith.constant 0 : index
    %3 = vector.load %arg4[%c0_5, %c0_6] : memref<8x128xf32, #tpu.memory_space<vmem>>, vector<8x128xf32>
    %c0_7 = arith.constant 0 : index
    %c0_8 = arith.constant 0 : index
    %4 = vector.load %arg5[%c0_7, %c0_8] : memref<8x128xf32, #tpu.memory_space<vmem>>, vector<8x128xf32>
    %c0_9 = arith.constant 0 : index
    %c0_10 = arith.constant 0 : index
    %5 = vector.load %arg6[%c0_9, %c0_10] : memref<1x128xf32, #tpu.memory_space<vmem>>, vector<1x128xf32>
    %6 = arith.mulf %0, %1 : vector<8x128xf32>
    %cst = arith.constant dense<0.000000e+00> : vector<8xf32>
    %7 = vector.multi_reduction <add>, %6, %cst [1] : vector<8x128xf32> to vector<8xf32>
    %8 = vector.shape_cast %7 : vector<8xf32> to vector<8x1xf32>
    %9 = arith.mulf %0, %0 : vector<8x128xf32>
    %cst_11 = arith.constant dense<0.000000e+00> : vector<8xf32>
    %10 = vector.multi_reduction <add>, %9, %cst_11 [1] : vector<8x128xf32> to vector<8xf32>
    %11 = vector.shape_cast %10 : vector<8xf32> to vector<8x1xf32>
    %12 = arith.mulf %1, %1 : vector<8x128xf32>
    %cst_12 = arith.constant dense<0.000000e+00> : vector<8xf32>
    %13 = vector.multi_reduction <add>, %12, %cst_12 [1] : vector<8x128xf32> to vector<8xf32>
    %14 = vector.shape_cast %13 : vector<8xf32> to vector<8x1xf32>
    %15 = arith.mulf %11, %14 : vector<8x1xf32>
    %cst_13 = arith.constant 1.000000e-16 : f32
    %16 = vector.broadcast %cst_13 : f32 to vector<8x1xf32>
    %17 = arith.maximumf %15, %16 : vector<8x1xf32>
    %18 = math.rsqrt %17 : vector<8x1xf32>
    %19 = arith.mulf %8, %18 : vector<8x1xf32>
    %20 = vector.broadcast %5 : vector<1x128xf32> to vector<8x128xf32>
    %21 = arith.mulf %0, %20 : vector<8x128xf32>
    %cst_14 = arith.constant dense<0.000000e+00> : vector<8xf32>
    %22 = vector.multi_reduction <add>, %21, %cst_14 [1] : vector<8x128xf32> to vector<8xf32>
    %23 = vector.shape_cast %22 : vector<8xf32> to vector<8x1xf32>
    %24 = vector.broadcast %5 : vector<1x128xf32> to vector<8x128xf32>
    %25 = arith.mulf %2, %24 : vector<8x128xf32>
    %cst_15 = arith.constant dense<0.000000e+00> : vector<8xf32>
    %26 = vector.multi_reduction <add>, %25, %cst_15 [1] : vector<8x128xf32> to vector<8xf32>
    %27 = vector.shape_cast %26 : vector<8xf32> to vector<8x1xf32>
    %28 = arith.mulf %19, %27 : vector<8x1xf32>
    %29 = vector.broadcast %5 : vector<1x128xf32> to vector<8x128xf32>
    %30 = arith.mulf %3, %29 : vector<8x128xf32>
    %cst_16 = arith.constant dense<0.000000e+00> : vector<8xf32>
    %31 = vector.multi_reduction <add>, %30, %cst_16 [1] : vector<8x128xf32> to vector<8xf32>
    %32 = vector.shape_cast %31 : vector<8xf32> to vector<8x1xf32>
    %33 = vector.broadcast %5 : vector<1x128xf32> to vector<8x128xf32>
    %34 = arith.mulf %4, %33 : vector<8x128xf32>
    %cst_17 = arith.constant dense<0.000000e+00> : vector<8xf32>
    %35 = vector.multi_reduction <add>, %34, %cst_17 [1] : vector<8x128xf32> to vector<8xf32>
    %36 = vector.shape_cast %35 : vector<8xf32> to vector<8x1xf32>
    %37 = arith.maximumf %23, %28 : vector<8x1xf32>
    %38 = arith.maximumf %32, %36 : vector<8x1xf32>
    %39 = arith.maximumf %37, %38 : vector<8x1xf32>
    %40 = arith.subf %23, %39 : vector<8x1xf32>
    %41 = math.exp %40 : vector<8x1xf32>
    %42 = arith.subf %28, %39 : vector<8x1xf32>
    %43 = math.exp %42 : vector<8x1xf32>
    %44 = arith.subf %32, %39 : vector<8x1xf32>
    %45 = math.exp %44 : vector<8x1xf32>
    %46 = arith.subf %36, %39 : vector<8x1xf32>
    %47 = math.exp %46 : vector<8x1xf32>
    %48 = arith.addf %41, %43 : vector<8x1xf32>
    %49 = arith.addf %48, %45 : vector<8x1xf32>
    %50 = arith.addf %49, %47 : vector<8x1xf32>
    %51 = tpu.reciprocal %50 {approx = true} : vector<8x1xf32> -> vector<8x1xf32>
    %52 = vector.broadcast %41 : vector<8x1xf32> to vector<8x128xf32>
    %53 = arith.mulf %52, %0 : vector<8x128xf32>
    %54 = arith.mulf %43, %19 : vector<8x1xf32>
    %55 = vector.broadcast %54 : vector<8x1xf32> to vector<8x128xf32>
    %56 = arith.mulf %55, %2 : vector<8x128xf32>
    %57 = arith.addf %53, %56 : vector<8x128xf32>
    %58 = vector.broadcast %45 : vector<8x1xf32> to vector<8x128xf32>
    %59 = arith.mulf %58, %3 : vector<8x128xf32>
    %60 = arith.addf %57, %59 : vector<8x128xf32>
    %61 = vector.broadcast %47 : vector<8x1xf32> to vector<8x128xf32>
    %62 = arith.mulf %61, %4 : vector<8x128xf32>
    %63 = arith.addf %60, %62 : vector<8x128xf32>
    %64 = vector.broadcast %51 : vector<8x1xf32> to vector<8x128xf32>
    %65 = arith.mulf %63, %64 : vector<8x128xf32>
    %c0_18 = arith.constant 0 : index
    %c0_19 = arith.constant 0 : index
    %66 = vector.load %arg7[%c0_18, %c0_19] : memref<8x128xf32, #tpu.memory_space<vmem>>, vector<8x128xf32>
    tpu.vector_store %arg7[%c0_18, %c0_19], %65 {strides = array<i32>} : memref<8x128xf32, #tpu.memory_space<vmem>>, vector<8x128xf32>,
    return
  }
  func.func @transform_0(%arg0: i32) -> (i32, i32) {
    %c0_i32 = arith.constant 0 : i32
    %c0_i32_0 = arith.constant 0 : i32
    return %arg0, %c0_i32 : i32, i32
  }
  func.func @transform_1(%arg0: i32) -> (i32, i32) {
    %c0_i32 = arith.constant 0 : i32
    %c0_i32_0 = arith.constant 0 : i32
    return %arg0, %c0_i32 : i32, i32
  }
  func.func @transform_2(%arg0: i32) -> (i32, i32) {
    %c0_i32 = arith.constant 0 : i32
    %c0_i32_0 = arith.constant 0 : i32
    return %arg0, %c0_i32 : i32, i32
  }
  func.func @transform_3(%arg0: i32) -> (i32, i32) {
    %c0_i32 = arith.constant 0 : i32
    %c0_i32_0 = arith.constant 0 : i32
    return %arg0, %c0_i32 : i32, i32
  }
  func.func @transform_4(%arg0: i32) -> (i32, i32) {
    %c0_i32 = arith.constant 0 : i32
    %c0_i32_0 = arith.constant 0 : i32
    return %arg0, %c0_i32 : i32, i32
  }
  func.func @transform_5(%arg0: i32) -> (i32, i32) {
    %c0_i32 = arith.constant 0 : i32
    %c0_i32_0 = arith.constant 0 : i32
    %c0_i32_1 = arith.constant 0 : i32
    return %c0_i32, %c0_i32_0 : i32, i32
  }
  func.func @transform_6(%arg0: i32) -> (i32, i32) {
    %c0_i32 = arith.constant 0 : i32
    %c0_i32_0 = arith.constant 0 : i32
    return %arg0, %c0_i32 : i32, i32
  }
}

</mosaic_0001>

<bundles_post_ra>
// kernel: tpu_custom_call.1
= control target key start
LH: loop header
LB: loop body
LE: loop exit
PB: predicated region body
PF: predicated region fallthrough
CT: control target
= control target key end

     0   :  { %11 = vsyncpa [#allocation3], 0  ;;  %s397_s0 = inlined_call_operand.hbm [shape: f32[8,128], index: 0, kind: input, shape index: {}]   ;;  %s398_s1 = inlined_call_operand.hbm [shape: f32[8,128], index: 1, kind: input, shape index: {}]   ;;  %s399_s2 = inlined_call_operand.hbm [shape: f32[8,128], index: 2, kind: input, shape index: {}]   ;;  %s400_s3 = inlined_call_operand.vmem [shape: f32[8,128], index: 3, kind: input, shape index: {}]   ;;  %s401_s4 = inlined_call_operand.hbm [shape: f32[8,128], index: 4, kind: input, shape index: {}]   ;;  %s402_s5 = inlined_call_operand.vmem [shape: f32[1,128], index: 5, kind: input, shape index: {}]   ;;  %s403_s6 = inlined_call_operand.hbm [shape: f32[8,128], index: 6, kind: output, shape index: {}]  }
   0x1   :  { %12 = vsyncpa [#allocation6], 0 }
   0x2   :  { %13 = vsyncpa [#allocation9], 0 }
   0x3   :  { %14 = vsyncpa [#allocation4], 0  ;;  %s291_s21 = smov [#allocation5]   ;;  %s292_s23 = smov [#allocation2]  }
   0x4   :  { %s31_s22 = sshll.u32 %s291_s21, 4  ;;  %s21_s24 = sshll.u32 %s292_s23, 4  ;;  %s32_s22 = int_to_ptr.vmem [resolvable:$true] %s31_s22  ;;  %s22_s24 = int_to_ptr.vmem [resolvable:$true] %s21_s24 }
   0x5   :  { %s173_s27 = scalar_lea.hbm %s398_s1, 128 }
   0x6   :  { %p174_p0 = scmp.ne.s32.totalorder %s398_s1, %s173_s27  ;;  %p177_p1 = scmp.lt.u32.totalorder %s173_s27, %s398_s1 }
   0x8   :  { %p179_p2 = pnand %p177_p1, %p174_p0 }
   0xa   :  { %182 = shalt.err (!%p179_p2)
}
   0xb   :  { %s183_s8 = scalar_lea.vmem %s32_s22, 128  ;;  %p188_p4 = scmp.lt.s32.totalorder %s32_s22, %s32_s22 }
   0xc   :  { %p184_p3 = scmp.ne.s32.totalorder %s32_s22, %s183_s8  ;;  %p189_p5 = scmp.lt.s32.totalorder %s183_s8, %s183_s8 }
   0xe   :  { %p190_p6 = por %p189_p5, %p188_p4 }
  0x10   :  { %p191_p7 = pnand %p190_p6, %p184_p3 }
  0x12   :  { %194 = shalt.err (!%p191_p7)
}
  0x13   :  { %34 = dma.hbm_to_vmem [thread:$0]  %s398_s1, 128, %s32_s22, [#allocation6]  }
  0x14   :  { %s195_s13 = scalar_lea.hbm %s397_s0, 128 }
  0x15   :  { %p196_p8 = scmp.ne.s32.totalorder %s397_s0, %s195_s13  ;;  %p199_p9 = scmp.lt.u32.totalorder %s195_s13, %s397_s0 }
  0x17   :  { %p201_p10 = pnand %p199_p9, %p196_p8 }
  0x19   :  { %204 = shalt.err (!%p201_p10)
}
  0x1a   :  { %s205_s18 = scalar_lea.vmem %s22_s24, 128  ;;  %p210_p12 = scmp.lt.s32.totalorder %s22_s24, %s22_s24 }
  0x1b   :  { %p206_p11 = scmp.ne.s32.totalorder %s22_s24, %s205_s18  ;;  %p211_p13 = scmp.lt.s32.totalorder %s205_s18, %s205_s18 }
  0x1d   :  { %p212_p0 = por %p211_p13, %p210_p12 }
  0x1f   :  { %p213_p1 = pnand %p212_p0, %p206_p11 }
  0x21   :  { %216 = shalt.err (!%p213_p1)
}
  0x22   :  { %24 = dma.hbm_to_vmem [thread:$0]  %s397_s0, 128, %s22_s24, [#allocation3]  }
  0x23   :  { %s293_s20 = smov [#allocation7]   ;;  %s294_s22 = smov [#allocation8]  }
  0x24   :  { %s41_s21 = sshll.u32 %s293_s20, 4  ;;  %s53_s23 = sshll.u32 %s294_s22, 4  ;;  %s42_s21 = int_to_ptr.vmem [resolvable:$true] %s41_s21  ;;  %s54_s23 = int_to_ptr.vmem [resolvable:$true] %s53_s23 }
  0x25   :  { %s217_s27 = scalar_lea.hbm %s399_s2, 128 }
  0x26   :  { %p218_p2 = scmp.ne.s32.totalorder %s399_s2, %s217_s27  ;;  %p221_p3 = scmp.lt.u32.totalorder %s217_s27, %s399_s2 }
  0x28   :  { %p223_p4 = pnand %p221_p3, %p218_p2 }
  0x2a   :  { %226 = shalt.err (!%p223_p4)
}
  0x2b   :  { %s227_s0 = scalar_lea.vmem %s42_s21, 128  ;;  %p232_p6 = scmp.lt.s32.totalorder %s42_s21, %s42_s21 }
  0x2c   :  { %p228_p5 = scmp.ne.s32.totalorder %s42_s21, %s227_s0  ;;  %p233_p7 = scmp.lt.s32.totalorder %s227_s0, %s227_s0 }
  0x2e   :  { %p234_p8 = por %p233_p7, %p232_p6 }
  0x30   :  { %p235_p9 = pnand %p234_p8, %p228_p5 }
  0x32   :  { %238 = shalt.err (!%p235_p9)
}
  0x33   :  { %44 = dma.hbm_to_vmem [thread:$0]  %s399_s2, 128, %s42_s21, [#allocation6]  }
  0x34   :  { %s239_s11 = scalar_lea.hbm %s401_s4, 128 }
  0x35   :  { %p240_p10 = scmp.ne.s32.totalorder %s401_s4, %s239_s11  ;;  %p243_p11 = scmp.lt.u32.totalorder %s239_s11, %s401_s4 }
  0x37   :  { %p245_p12 = pnand %p243_p11, %p240_p10 }
  0x39   :  { %248 = shalt.err (!%p245_p12)
}
  0x3a   :  { %s249_s16 = scalar_lea.vmem %s54_s23, 128  ;;  %p254_p0 = scmp.lt.s32.totalorder %s54_s23, %s54_s23 }
  0x3b   :  { %p250_p13 = scmp.ne.s32.totalorder %s54_s23, %s249_s16  ;;  %p255_p1 = scmp.lt.s32.totalorder %s249_s16, %s249_s16 }
  0x3d   :  { %p256_p2 = por %p255_p1, %p254_p0 }
  0x3f   :  { %p257_p3 = pnand %p256_p2, %p250_p13 }
  0x41   :  { %260 = shalt.err (!%p257_p3)
}
  0x42   :  { %56 = dma.hbm_to_vmem [thread:$0]  %s401_s4, 128, %s54_s23, [#allocation9]  }
  0x43   :  { %283 = dma.done.wait [#allocation3], 128  }
  0x44   :  { %284 = vsyncadd [#allocation3], 4294967168 }
  0x45   :  { %285 = dma.done.wait [#allocation6], 256  }
  0x46   :  { %286 = vsyncadd [#allocation6], 4294967040 }
  0x47   :  { %287 = dma.done.wait [#allocation9], 128  }
  0x48   :  { %288 = vsyncadd [#allocation9], 4294967168  ;;  %v71_v0 = vld [vmem:[#allocation2] sm:$0xff]  ;;  %v72_v1 = vld [vmem:[#allocation5] sm:$0xff] }
  0x49   :  { %v155_v2 = vld [vmem:[%s402_s5] ss:$0 sm:$0xff]  ;;  %v80_v3 = vmul.f32 %v71_v0, %v71_v0  ;;  %v77_v4 = vmul.f32 %v72_v1, %v71_v0  ;;  %v73_v5 = vld [vmem:[#allocation7] sm:$0xff]  ;;  %v83_v6 = vmul.f32 %v72_v1, %v72_v1  ;;  %v75_v11 = vld [vmem:[#allocation8] sm:$0xff] }
  0x4a   :  { %v99_v7 = vmul.f32 %v155_v2, %v73_v5  ;;  %v74_v8 = vld [vmem:[%s400_s3] sm:$0xff]  ;;  %v96_v9 = vmul.f32 %v155_v2, %v71_v0  ;;  %v106_v12 = vmul.f32 %v155_v2, %v75_v11  ;;  %s295_s3 = smov [#allocation10]  }
  0x4b   :  { %81 = vadd.xlane.f32.xlu0 %v80_v3  ;;  %78 = vadd.xlane.f32.xlu1 %v77_v4  ;;  %v103_v10 = vmul.f32 %v155_v2, %v74_v8  ;;  %s144_s5 = sshll.u32 %s295_s3, 4  ;;  %s145_s5 = int_to_ptr.vmem [resolvable:$true] %s144_s5 }
  0x4c   :  { %s261_s20 = scalar_lea.vmem %s145_s5, 128  ;;  %p266_p5 = scmp.lt.s32.totalorder %s145_s5, %s145_s5 }
  0x4d   :  { %p262_p4 = scmp.ne.s32.totalorder %s145_s5, %s261_s20  ;;  %p267_p6 = scmp.lt.s32.totalorder %s261_s20, %s261_s20 }
  0x4f   :  { %84 = vadd.xlane.f32.xlu0 %v83_v6  ;;  %100 = vadd.xlane.f32.xlu1 %v99_v7  ;;  %p268_p7 = por %p267_p6, %p266_p5 }
  0x51   :  { %p269_p8 = pnand %p268_p7, %p262_p4 }
  0x53   :  { %97 = vadd.xlane.f32.xlu0 %v96_v9  ;;  %104 = vadd.xlane.f32.xlu1 %v103_v10 }
  0x57   :  { %107 = vadd.xlane.f32.xlu0 %v106_v12 }
  0xd8   :  { %v82_v13 = vpop.xlane.xlu0 %81  ;;  %v79_v17 = vpop.xlane.xlu1 %78 }
  0xdc   :  { %v85_v14 = vpop.xlane.xlu0 %84  ;;  %v101_v19 = vpop.xlane.xlu1 %100 }
  0xdd   :  { %v86_v15 = vmul.f32 %v85_v14, %v82_v13 }
  0xdf   :  { %v87_v16 = vmax.f32 %v86_v15, 1e-16 }
  0xe0   :  { %v98_v18 = vpop.xlane.xlu0 %97  ;;  %v105_v22 = vpop.xlane.xlu1 %104 }
  0xe1   :  { %161 = vrsqrt.f32 %v87_v16 }
  0xe4   :  { %v108_v21 = vpop.xlane.xlu0 %107 }
  0xe5   :  { %v110_v25 = vmax.f32 %v105_v22, %v108_v21 }
  0xeb   :  { %v162_v20 = vpop.eup %161 }
  0xec   :  { %v89_v23 = vmul.f32 %v162_v20, %v79_v17 }
  0xee   :  { %v102_v24 = vmul.f32 %v101_v19, %v89_v23 }
  0xf0   :  { %v109_v26 = vmax.f32 %v98_v18, %v102_v24 }
  0xf2   :  { %v111_v27 = vmax.f32 %v109_v26, %v110_v25 }
  0xf4   :  { %v112_v28 = vsub.f32 %v98_v18, %v111_v27  ;;  %v115_v29 = vsub.f32 %v102_v24, %v111_v27  ;;  %v118_v30 = vsub.f32 %v105_v22, %v111_v27  ;;  %v121_v31 = vsub.f32 %v108_v21, %v111_v27 }
  0xf6   :  { %v113_v32 = vmul.f32 1.442695, %v112_v28  ;;  %v116_v33 = vmul.f32 1.442695, %v115_v29  ;;  %v119_v34 = vmul.f32 1.442695, %v118_v30 }
  0xf7   :  { %v122_v35 = vmul.f32 1.442695, %v121_v31 }
  0xf8   :  { %163 = vpow2.f32 %v113_v32 }
  0xf9   :  { %165 = vpow2.f32 %v116_v33 }
  0xfa   :  { %167 = vpow2.f32 %v119_v34 }
  0xfb   :  { %169 = vpow2.f32 %v122_v35 }
 0x102   :  { %v164_v36 = vpop.eup %163 }
 0x103   :  { %v166_v37 = vpop.eup %165  ;;  %v128_v45 = vmul.f32 %v164_v36, %v71_v0 }
 0x104   :  { %v124_v38 = vadd.f32 %v166_v37, %v164_v36  ;;  %v129_v39 = vmul.f32 %v166_v37, %v89_v23  ;;  %v168_v40 = vpop.eup %167 }
 0x105   :  { %v170_v42 = vpop.eup %169  ;;  %v132_v47 = vmul.f32 %v168_v40, %v74_v8 }
 0x106   :  { %v125_v41 = vadd.f32 %v168_v40, %v124_v38  ;;  %v130_v43 = vmul.f32 %v129_v39, %v73_v5  ;;  %v134_v49 = vmul.f32 %v170_v42, %v75_v11 }
 0x108   :  { %v126_v44 = vadd.f32 %v170_v42, %v125_v41  ;;  %v131_v46 = vadd.f32 %v130_v43, %v128_v45 }
 0x10a   :  { %171 = vrcp.f32 %v126_v44  ;;  %v133_v48 = vadd.f32 %v132_v47, %v131_v46 }
 0x10c   :  { %v135_v50 = vadd.f32 %v134_v49, %v133_v48 }
 0x114   :  { %v172_v51 = vpop.eup %171 }
 0x115   :  { %v136_v52 = vmul.f32 %v172_v51, %v135_v50 }
 0x117   :  { %137 = vst [vmem:[#allocation10] sm:$0xff] %v136_v52 }
 0x118   :  { %272 = shalt.err (!%p269_p8)
}
 0x119   :  { %s273_s23 = scalar_lea.hbm %s403_s6, 128 }
 0x11a   :  { %p274_p9 = scmp.ne.s32.totalorder %s403_s6, %s273_s23  ;;  %p277_p10 = scmp.lt.u32.totalorder %s273_s23, %s403_s6 }
 0x11c   :  { %p279_p11 = pnand %p277_p10, %p274_p9 }
 0x11e   :  { %282 = shalt.err (!%p279_p11)
}
 0x11f   :  { %147 = dma.vmem_to_hbm [thread:$0]  %s145_s5, 128, %s403_s6, [#allocation4]  }
 0x120   :  { %289 = dma.done.wait [#allocation4], 128  }
 0x121   :  { %290 = vsyncadd [#allocation4], 4294967168 }
 0x122   :  { %151 = vsyncpa [#allocation3], 1 }
 0x123   :  { %152 = vsyncpa [#allocation6], 1 }
 0x124   :  { %153 = vsyncpa [#allocation9], 1 }
 0x125   :  { %154 = vsyncpa [#allocation4], 1 }

</bundles_post_ra>
